<compile_context>
chip_gen: v7x
topology: tpu7x:2x2x1
jax: 0.10.0
libtpu: 0.0.40
codegen_flags: <defaults>
</compile_context>

<pallas_src>
import jax
import jax.numpy as jnp
from jax.experimental import pallas as pl
from jax.experimental.pallas import tpu as pltpu

LANE = 128


def _round_up(n, m):
    return ((n + m - 1) // m) * m


# --------------------------------------------------------------------------- #
# Kernel
# --------------------------------------------------------------------------- #
def mlp_kernel(x_ref,
               w1_ref, b1_ref,
               w2_ref, b2_ref,
               w3_ref, b3_ref,
               w4_ref, b4_ref,
               w5_ref, b5_ref,
               wo_ref, bo_ref,
               out_ref):
    """Fused MLP tile: (x**2) -> 5x (Linear+ReLU, bf16 MXU / f32 acc)
    -> final 16->1 layer as f32 VPU broadcast-mult + lane reduction."""
    z = x_ref[...]          # (tile_b, in_dim) f32
    z = z * z               # x ** 2 on the VPU, f32

    def dense_relu(z, w_ref, b_ref):
        # bf16 inputs to the MXU (f32 matmul is multi-pass emulated on all
        # generations), f32 accumulation; bias-add + ReLU stay f32 on the VPU.
        y = jnp.dot(z.astype(w_ref.dtype), w_ref[...],
                    preferred_element_type=jnp.float32)
        return jnp.maximum(y + b_ref[...], 0.0)

    z = dense_relu(z, w1_ref, b1_ref)
    z = dense_relu(z, w2_ref, b2_ref)
    z = dense_relu(z, w3_ref, b3_ref)
    z = dense_relu(z, w4_ref, b4_ref)
    z = dense_relu(z, w5_ref, b5_ref)

    # Final (16 -> 1) layer: a padded 128x128 MXU matmul would produce a single
    # useful column, so do it on the VPU/XLU (which have slack) and store only
    # a narrow (tile_b, 1) result.  Padded lanes of z and wo are exact zeros.
    y = jnp.sum(z * wo_ref[...], axis=-1, keepdims=True) + bo_ref[...]
    out_ref[...] = y.astype(out_ref.dtype)


# --------------------------------------------------------------------------- #
# Parameter prep
# --------------------------------------------------------------------------- #
def pad_params(params):
    """Split/pad parameters for the kernel.

    Hidden layers (all but the last): weights cast to bf16 and zero-padded to
    (in_pad, out_pad) with out_pad a multiple of 128; biases kept f32 as
    (1, out_pad).  Padded output columns get bias 0 and stay 0 through ReLU and
    padded input rows are 0, so valid results are unchanged.

    Final layer (output width must be 1): returned as an f32 lane-vector
    wo (1, in_pad) plus scalar bias bo (1, 1) for the in-kernel VPU reduction.
    """
    *hidden_raw, (wo_raw, bo_raw) = params
    assert wo_raw.shape[1] == 1, "final layer must have a single output column"

    hidden = []
    prev_out_pad = None
    for li, (w, b) in enumerate(hidden_raw):
        d_in, d_out = w.shape
        in_pad = d_in if li == 0 else prev_out_pad
        out_pad = _round_up(d_out, LANE)
        wp = jnp.zeros((in_pad, out_pad), jnp.bfloat16).at[:d_in, :d_out].set(
            w.astype(jnp.bfloat16))
        bp = jnp.zeros((1, out_pad), jnp.float32).at[:, :d_out].set(
            b.astype(jnp.float32))
        hidden.append((wp, bp))
        prev_out_pad = out_pad

    d_in = wo_raw.shape[0]
    wo = jnp.zeros((1, prev_out_pad), jnp.float32).at[0, :d_in].set(wo_raw[:, 0])
    bo = bo_raw.reshape(1, 1).astype(jnp.float32)
    return hidden, (wo, bo)


def make_params(key, input_size, hidden_size):
    """Layer sizes for model_output_capacity=True.
    hid1/hid2/hid3/oupt: xavier_uniform weight + zero bias (explicit in PyTorch).
    hid4/hid5: nn.Linear defaults (kaiming_uniform weight, uniform +-1/sqrt(fan_in) bias)."""
    dims = [input_size,
            hidden_size * 3,
            hidden_size * 2,
            hidden_size,
            hidden_size // 2,
            hidden_size // 3,
            1]
    explicit_init = [True, True, True, False, False, True]
    params = []
    keys = jax.random.split(key, 2 * (len(dims) - 1))
    for li, (d_in, d_out) in enumerate(zip(dims[:-1], dims[1:])):
        kw, kb = keys[2 * li], keys[2 * li + 1]
        if explicit_init[li]:
            limit = (6.0 / (d_in + d_out)) ** 0.5          # xavier_uniform_
            w = jax.random.uniform(kw, (d_out, d_in), minval=-limit, maxval=limit,
                                   dtype=jnp.float32)
            b = jnp.zeros((d_out,), jnp.float32)           # zeros_
        else:
            wlim = (1.0 / d_in) ** 0.5                     # kaiming_uniform_(a=sqrt(5))
            w = jax.random.uniform(kw, (d_out, d_in), minval=-wlim, maxval=wlim,
                                   dtype=jnp.float32)
            blim = 1.0 / (d_in ** 0.5)                     # default Linear bias init
            b = jax.random.uniform(kb, (d_out,), minval=-blim, maxval=blim,
                                   dtype=jnp.float32)
        # Pre-transpose to (in, out) for x @ W; bias as (1, out) for broadcast.
        params.append((w.T, b.reshape(1, d_out)))
    return params


# --------------------------------------------------------------------------- #
# Wrapper
# --------------------------------------------------------------------------- #
def net_forward(x, params, *, tile_b=1024):
    """x: (B, input_size) f32.  params: unpadded [(W(in,out), b(1,out)), ...]."""
    B, in_dim = x.shape
    hidden, (wo, bo) = pad_params(params)

    # ---- batch tiling -------------------------------------------------------
    b_ceil = _round_up(B, 8)
    tile_b = _round_up(max(8, min(int(tile_b), b_ceil)), 8)
    # Keep >= 2 grid steps when the batch allows, so dimension_semantics=
    # ("parallel",) can split the batch across both v7x TensorCores.
    if b_ceil >= 16:
        tile_b = min(tile_b, _round_up((b_ceil + 1) // 2, 8))
    b_pad = _round_up(B, tile_b)
    if b_pad != B:
        x = jnp.pad(x, ((0, b_pad - B), (0, 0)))
    grid = (b_pad // tile_b,)

    flat = [x]
    in_specs = [pl.BlockSpec((tile_b, in_dim), lambda i: (i, 0))]
    for w, b in hidden:
        flat += [w, b]
        # Constant index_map -> weights/biases stay VMEM-resident across the grid.
        in_specs.append(pl.BlockSpec(w.shape, lambda i: (0, 0)))
        in_specs.append(pl.BlockSpec(b.shape, lambda i: (0, 0)))
    flat += [wo, bo]
    in_specs.append(pl.BlockSpec(wo.shape, lambda i: (0, 0)))
    in_specs.append(pl.BlockSpec(bo.shape, lambda i: (0, 0)))

    out_spec = pl.BlockSpec((tile_b, 1), lambda i: (i, 0))

    # Advisory cost hint for XLA's scheduler.
    mxu_flops = sum(2 * b_pad * w.shape[0] * w.shape[1] for w, _ in hidden)
    vpu_flops = b_pad * in_dim + 2 * b_pad * wo.shape[1]
    bytes_accessed = (4 * b_pad * in_dim
                      + sum(w.size * 2 + b.size * 4 for w, b in hidden)
                      + 4 * (wo.size + bo.size)
                      + 4 * b_pad)

    out = pl.pallas_call(
        mlp_kernel,
        out_shape=jax.ShapeDtypeStruct((b_pad, 1), jnp.float32),
        grid=grid,
        in_specs=in_specs,
        out_specs=out_spec,
        compiler_params=pltpu.CompilerParams(
            dimension_semantics=("parallel",),        # megacore sharding on v7x
            vmem_limit_bytes=32 * 1024 * 1024),       # portable ceiling (v7x: 64 MiB VMEM)
        cost_estimate=pl.CostEstimate(
            flops=int(mxu_flops + vpu_flops), transcendentals=0,
            bytes_accessed=int(bytes_accessed)),
    )(*flat)

    # Drop batch padding; output is already a single column.
    return out[:B]


def reference_forward(x, params):
    """Numerics-matched pure-JAX reference: same math as the kernel (bf16 MXU
    inputs / f32 accumulation for the hidden layers, pure-f32 elementwise final
    layer), which is the PyTorch forward up to bf16 input rounding."""
    z = x * x
    *hidden, (wo, bo) = params
    for w, b in hidden:
        z = jnp.dot(z.astype(jnp.bfloat16), w.astype(jnp.bfloat16),
                    preferred_element_type=jnp.float32) + b
        z = jnp.maximum(z, 0.0)
    return jnp.sum(z * wo[:, 0][None, :], axis=-1, keepdims=True) + bo


# --------------------------------------------------------------------------- #
# Main
# --------------------------------------------------------------------------- #
if __name__ == "__main__":
    input_size = 32
    hidden_size = 48      # layers: 32 -> 144 -> 96 -> 48 -> 24 -> 16 -> 1

    key = jax.random.PRNGKey(0)
    kx, kx2, kp = jax.random.split(key, 3)
    params = make_params(kp, input_size, hidden_size)

    # Small batch (single grid step).
    x_small = jax.random.normal(kx, (8, input_size), dtype=jnp.float32)
    out_small = jax.block_until_ready(net_forward(x_small, params))
    ref_small = reference_forward(x_small, params)
    assert out_small.shape == (8, 1), out_small.shape
    assert jnp.allclose(out_small, ref_small, atol=2e-3, rtol=2e-3), "small-batch mismatch"

    # Non-multiple batch with the default tile: exercises the >=2-step megacore
    # cap, batch padding and the slice path (grid=(2,) here).
    x_big = jax.random.normal(kx2, (300, input_size), dtype=jnp.float32)
    out_big = jax.block_until_ready(net_forward(x_big, params))
    ref_big = reference_forward(x_big, params)
    assert out_big.shape == (300, 1), out_big.shape
    assert jnp.allclose(out_big, ref_big, atol=2e-3, rtol=2e-3), "big-batch mismatch"

    # Explicit small tile: multi-step grid with a partially padded last tile.
    out_big2 = jax.block_until_ready(net_forward(x_big, params, tile_b=128))
    assert out_big2.shape == (300, 1), out_big2.shape
    assert jnp.allclose(out_big2, ref_big, atol=2e-3, rtol=2e-3), "tiled-batch mismatch"

    print("KERNEL_OK")
</pallas_src>

<mosaic_0001>
module attributes {stable_mosaic.version = 11 : i64} {
  func.func @mlp_kernel(%arg0: i32, %arg1: memref<8x32xf32, #tpu.memory_space<vmem>>, %arg2: memref<32x256xbf16, #tpu.memory_space<vmem>>, %arg3: memref<1x256xf32, #tpu.memory_space<vmem>>, %arg4: memref<256x128xbf16, #tpu.memory_space<vmem>>, %arg5: memref<1x128xf32, #tpu.memory_space<vmem>>, %arg6: memref<128x128xbf16, #tpu.memory_space<vmem>>, %arg7: memref<1x128xf32, #tpu.memory_space<vmem>>, %arg8: memref<128x128xbf16, #tpu.memory_space<vmem>>, %arg9: memref<1x128xf32, #tpu.memory_space<vmem>>, %arg10: memref<128x128xbf16, #tpu.memory_space<vmem>>, %arg11: memref<1x128xf32, #tpu.memory_space<vmem>>, %arg12: memref<1x128xf32, #tpu.memory_space<vmem>>, %arg13: memref<1x1xf32, #tpu.memory_space<vmem>>, %arg14: memref<8x1xf32, #tpu.memory_space<vmem>>) attributes {dimension_semantics = [#tpu.dimension_semantics<parallel>], iteration_bounds = array<i64: 1>, scalar_prefetch = 0 : i64, scratch_operands = 0 : i64, tpu.core_type = #tpu.core_type<tc>, window_params = [{transform_indices = @transform_0, window_bounds = array<i64: 8, 32>}, {pipeline_mode = #tpu.pipeline_mode<synchronous>, transform_indices = @transform_1, window_bounds = array<i64: 32, 256>}, {pipeline_mode = #tpu.pipeline_mode<synchronous>, transform_indices = @transform_2, window_bounds = array<i64: 1, 256>}, {pipeline_mode = #tpu.pipeline_mode<synchronous>, transform_indices = @transform_3, window_bounds = array<i64: 256, 128>}, {pipeline_mode = #tpu.pipeline_mode<synchronous>, transform_indices = @transform_4, window_bounds = array<i64: 1, 128>}, {pipeline_mode = #tpu.pipeline_mode<synchronous>, transform_indices = @transform_5, window_bounds = array<i64: 128, 128>}, {pipeline_mode = #tpu.pipeline_mode<synchronous>, transform_indices = @transform_6, window_bounds = array<i64: 1, 128>}, {pipeline_mode = #tpu.pipeline_mode<synchronous>, transform_indices = @transform_7, window_bounds = array<i64: 128, 128>}, {pipeline_mode = #tpu.pipeline_mode<synchronous>, transform_indices = @transform_8, window_bounds = array<i64: 1, 128>}, {pipeline_mode = #tpu.pipeline_mode<synchronous>, transform_indices = @transform_9, window_bounds = array<i64: 128, 128>}, {pipeline_mode = #tpu.pipeline_mode<synchronous>, transform_indices = @transform_10, window_bounds = array<i64: 1, 128>}, {pipeline_mode = #tpu.pipeline_mode<synchronous>, transform_indices = @transform_11, window_bounds = array<i64: 1, 128>}, {pipeline_mode = #tpu.pipeline_mode<synchronous>, transform_indices = @transform_12, window_bounds = array<i64: 1, 1>}, {transform_indices = @transform_13, window_bounds = array<i64: 8, 1>}]} {
    %c0 = arith.constant 0 : index
    %c0_0 = arith.constant 0 : index
    %0 = vector.load %arg1[%c0, %c0_0] : memref<8x32xf32, #tpu.memory_space<vmem>>, vector<8x32xf32>
    %1 = arith.mulf %0, %0 : vector<8x32xf32>
    %2 = arith.truncf %1 : vector<8x32xf32> to vector<8x32xbf16>
    %c0_1 = arith.constant 0 : index
    %c0_2 = arith.constant 0 : index
    %3 = vector.load %arg2[%c0_1, %c0_2] : memref<32x256xbf16, #tpu.memory_space<vmem>>, vector<32x256xbf16>
    %cst = arith.constant dense<0.000000e+00> : vector<8x256xf32>
    %4 = tpu.matmul %2, %3, %cst {dimension_numbers = #tpu.dot_dimension_numbers<[1], [0], [0], [1], [0, 0, 1, 1], [], []>} : vector<8x32xbf16>, vector<32x256xbf16>, vector<8x256xf32> -> vector<8x256xf32>
    %c0_3 = arith.constant 0 : index
    %c0_4 = arith.constant 0 : index
    %5 = vector.load %arg3[%c0_3, %c0_4] : memref<1x256xf32, #tpu.memory_space<vmem>>, vector<1x256xf32>
    %6 = vector.broadcast %5 : vector<1x256xf32> to vector<8x256xf32>
    %7 = arith.addf %4, %6 : vector<8x256xf32>
    %cst_5 = arith.constant 0.000000e+00 : f32
    %8 = vector.broadcast %cst_5 : f32 to vector<8x256xf32>
    %9 = arith.maximumf %7, %8 : vector<8x256xf32>
    %10 = arith.truncf %9 : vector<8x256xf32> to vector<8x256xbf16>
    %c0_6 = arith.constant 0 : index
    %c0_7 = arith.constant 0 : index
    %11 = vector.load %arg4[%c0_6, %c0_7] : memref<256x128xbf16, #tpu.memory_space<vmem>>, vector<256x128xbf16>
    %cst_8 = arith.constant dense<0.000000e+00> : vector<8x128xf32>
    %12 = tpu.matmul %10, %11, %cst_8 {dimension_numbers = #tpu.dot_dimension_numbers<[1], [0], [0], [1], [0, 0, 1, 1], [], []>} : vector<8x256xbf16>, vector<256x128xbf16>, vector<8x128xf32> -> vector<8x128xf32>
    %c0_9 = arith.constant 0 : index
    %c0_10 = arith.constant 0 : index
    %13 = vector.load %arg5[%c0_9, %c0_10] : memref<1x128xf32, #tpu.memory_space<vmem>>, vector<1x128xf32>
    %14 = vector.broadcast %13 : vector<1x128xf32> to vector<8x128xf32>
    %15 = arith.addf %12, %14 : vector<8x128xf32>
    %cst_11 = arith.constant 0.000000e+00 : f32
    %16 = vector.broadcast %cst_11 : f32 to vector<8x128xf32>
    %17 = arith.maximumf %15, %16 : vector<8x128xf32>
    %18 = arith.truncf %17 : vector<8x128xf32> to vector<8x128xbf16>
    %c0_12 = arith.constant 0 : index
    %c0_13 = arith.constant 0 : index
    %19 = vector.load %arg6[%c0_12, %c0_13] : memref<128x128xbf16, #tpu.memory_space<vmem>>, vector<128x128xbf16>
    %cst_14 = arith.constant dense<0.000000e+00> : vector<8x128xf32>
    %20 = tpu.matmul %18, %19, %cst_14 {dimension_numbers = #tpu.dot_dimension_numbers<[1], [0], [0], [1], [0, 0, 1, 1], [], []>} : vector<8x128xbf16>, vector<128x128xbf16>, vector<8x128xf32> -> vector<8x128xf32>
    %c0_15 = arith.constant 0 : index
    %c0_16 = arith.constant 0 : index
    %21 = vector.load %arg7[%c0_15, %c0_16] : memref<1x128xf32, #tpu.memory_space<vmem>>, vector<1x128xf32>
    %22 = vector.broadcast %21 : vector<1x128xf32> to vector<8x128xf32>
    %23 = arith.addf %20, %22 : vector<8x128xf32>
    %cst_17 = arith.constant 0.000000e+00 : f32
    %24 = vector.broadcast %cst_17 : f32 to vector<8x128xf32>
    %25 = arith.maximumf %23, %24 : vector<8x128xf32>
    %26 = arith.truncf %25 : vector<8x128xf32> to vector<8x128xbf16>
    %c0_18 = arith.constant 0 : index
    %c0_19 = arith.constant 0 : index
    %27 = vector.load %arg8[%c0_18, %c0_19] : memref<128x128xbf16, #tpu.memory_space<vmem>>, vector<128x128xbf16>
    %cst_20 = arith.constant dense<0.000000e+00> : vector<8x128xf32>
    %28 = tpu.matmul %26, %27, %cst_20 {dimension_numbers = #tpu.dot_dimension_numbers<[1], [0], [0], [1], [0, 0, 1, 1], [], []>} : vector<8x128xbf16>, vector<128x128xbf16>, vector<8x128xf32> -> vector<8x128xf32>
    %c0_21 = arith.constant 0 : index
    %c0_22 = arith.constant 0 : index
    %29 = vector.load %arg9[%c0_21, %c0_22] : memref<1x128xf32, #tpu.memory_space<vmem>>, vector<1x128xf32>
    %30 = vector.broadcast %29 : vector<1x128xf32> to vector<8x128xf32>
    %31 = arith.addf %28, %30 : vector<8x128xf32>
    %cst_23 = arith.constant 0.000000e+00 : f32
    %32 = vector.broadcast %cst_23 : f32 to vector<8x128xf32>
    %33 = arith.maximumf %31, %32 : vector<8x128xf32>
    %34 = arith.truncf %33 : vector<8x128xf32> to vector<8x128xbf16>
    %c0_24 = arith.constant 0 : index
    %c0_25 = arith.constant 0 : index
    %35 = vector.load %arg10[%c0_24, %c0_25] : memref<128x128xbf16, #tpu.memory_space<vmem>>, vector<128x128xbf16>
    %cst_26 = arith.constant dense<0.000000e+00> : vector<8x128xf32>
    %36 = tpu.matmul %34, %35, %cst_26 {dimension_numbers = #tpu.dot_dimension_numbers<[1], [0], [0], [1], [0, 0, 1, 1], [], []>} : vector<8x128xbf16>, vector<128x128xbf16>, vector<8x128xf32> -> vector<8x128xf32>
    %c0_27 = arith.constant 0 : index
    %c0_28 = arith.constant 0 : index
    %37 = vector.load %arg11[%c0_27, %c0_28] : memref<1x128xf32, #tpu.memory_space<vmem>>, vector<1x128xf32>
    %38 = vector.broadcast %37 : vector<1x128xf32> to vector<8x128xf32>
    %39 = arith.addf %36, %38 : vector<8x128xf32>
    %cst_29 = arith.constant 0.000000e+00 : f32
    %40 = vector.broadcast %cst_29 : f32 to vector<8x128xf32>
    %41 = arith.maximumf %39, %40 : vector<8x128xf32>
    %c0_30 = arith.constant 0 : index
    %c0_31 = arith.constant 0 : index
    %42 = vector.load %arg12[%c0_30, %c0_31] : memref<1x128xf32, #tpu.memory_space<vmem>>, vector<1x128xf32>
    %43 = vector.broadcast %42 : vector<1x128xf32> to vector<8x128xf32>
    %44 = arith.mulf %41, %43 : vector<8x128xf32>
    %cst_32 = arith.constant dense<0.000000e+00> : vector<8xf32>
    %45 = vector.multi_reduction <add>, %44, %cst_32 [1] : vector<8x128xf32> to vector<8xf32>
    %46 = vector.shape_cast %45 : vector<8xf32> to vector<8x1xf32>
    %c0_33 = arith.constant 0 : index
    %c0_34 = arith.constant 0 : index
    %47 = vector.load %arg13[%c0_33, %c0_34] : memref<1x1xf32, #tpu.memory_space<vmem>>, vector<1x1xf32>
    %48 = vector.broadcast %47 : vector<1x1xf32> to vector<8x1xf32>
    %49 = arith.addf %46, %48 : vector<8x1xf32>
    %c0_35 = arith.constant 0 : index
    %c0_36 = arith.constant 0 : index
    %50 = vector.load %arg14[%c0_35, %c0_36] : memref<8x1xf32, #tpu.memory_space<vmem>>, vector<8x1xf32>
    tpu.vector_store %arg14[%c0_35, %c0_36], %49 {strides = array<i32>} : memref<8x1xf32, #tpu.memory_space<vmem>>, vector<8x1xf32>,
    return
  }
  func.func @transform_0(%arg0: i32) -> (i32, i32) {
    %c0_i32 = arith.constant 0 : i32
    %c0_i32_0 = arith.constant 0 : i32
    return %arg0, %c0_i32 : i32, i32
  }
  func.func @transform_1(%arg0: i32) -> (i32, i32) {
    %c0_i32 = arith.constant 0 : i32
    %c0_i32_0 = arith.constant 0 : i32
    %c0_i32_1 = arith.constant 0 : i32
    return %c0_i32, %c0_i32_0 : i32, i32
  }
  func.func @transform_2(%arg0: i32) -> (i32, i32) {
    %c0_i32 = arith.constant 0 : i32
    %c0_i32_0 = arith.constant 0 : i32
    %c0_i32_1 = arith.constant 0 : i32
    return %c0_i32, %c0_i32_0 : i32, i32
  }
  func.func @transform_3(%arg0: i32) -> (i32, i32) {
    %c0_i32 = arith.constant 0 : i32
    %c0_i32_0 = arith.constant 0 : i32
    %c0_i32_1 = arith.constant 0 : i32
    return %c0_i32, %c0_i32_0 : i32, i32
  }
  func.func @transform_4(%arg0: i32) -> (i32, i32) {
    %c0_i32 = arith.constant 0 : i32
    %c0_i32_0 = arith.constant 0 : i32
    %c0_i32_1 = arith.constant 0 : i32
    return %c0_i32, %c0_i32_0 : i32, i32
  }
  func.func @transform_5(%arg0: i32) -> (i32, i32) {
    %c0_i32 = arith.constant 0 : i32
    %c0_i32_0 = arith.constant 0 : i32
    %c0_i32_1 = arith.constant 0 : i32
    return %c0_i32, %c0_i32_0 : i32, i32
  }
  func.func @transform_6(%arg0: i32) -> (i32, i32) {
    %c0_i32 = arith.constant 0 : i32
    %c0_i32_0 = arith.constant 0 : i32
    %c0_i32_1 = arith.constant 0 : i32
    return %c0_i32, %c0_i32_0 : i32, i32
  }
  func.func @transform_7(%arg0: i32) -> (i32, i32) {
    %c0_i32 = arith.constant 0 : i32
    %c0_i32_0 = arith.constant 0 : i32
    %c0_i32_1 = arith.constant 0 : i32
    return %c0_i32, %c0_i32_0 : i32, i32
  }
  func.func @transform_8(%arg0: i32) -> (i32, i32) {
    %c0_i32 = arith.constant 0 : i32
    %c0_i32_0 = arith.constant 0 : i32
    %c0_i32_1 = arith.constant 0 : i32
    return %c0_i32, %c0_i32_0 : i32, i32
  }
  func.func @transform_9(%arg0: i32) -> (i32, i32) {
    %c0_i32 = arith.constant 0 : i32
    %c0_i32_0 = arith.constant 0 : i32
    %c0_i32_1 = arith.constant 0 : i32
    return %c0_i32, %c0_i32_0 : i32, i32
  }
  func.func @transform_10(%arg0: i32) -> (i32, i32) {
    %c0_i32 = arith.constant 0 : i32
    %c0_i32_0 = arith.constant 0 : i32
    %c0_i32_1 = arith.constant 0 : i32
    return %c0_i32, %c0_i32_0 : i32, i32
  }
  func.func @transform_11(%arg0: i32) -> (i32, i32) {
    %c0_i32 = arith.constant 0 : i32
    %c0_i32_0 = arith.constant 0 : i32
    %c0_i32_1 = arith.constant 0 : i32
    return %c0_i32, %c0_i32_0 : i32, i32
  }
  func.func @transform_12(%arg0: i32) -> (i32, i32) {
    %c0_i32 = arith.constant 0 : i32
    %c0_i32_0 = arith.constant 0 : i32
    %c0_i32_1 = arith.constant 0 : i32
    return %c0_i32, %c0_i32_0 : i32, i32
  }
  func.func @transform_13(%arg0: i32) -> (i32, i32) {
    %c0_i32 = arith.constant 0 : i32
    %c0_i32_0 = arith.constant 0 : i32
    return %arg0, %c0_i32 : i32, i32
  }
}

</mosaic_0001>

<bundles_post_ra>
// kernel: tpu_custom_call.1
= control target key start
LH: loop header
LB: loop body
LE: loop exit
PB: predicated region body
PF: predicated region fallthrough
CT: control target
= control target key end

     0   :  { %s1338_s0 = inlined_call_operand.hbm [shape: f32[8,32], index: 0, kind: input, shape index: {}]   ;;  %s1339_s1 = inlined_call_operand.hbm [shape: bf16[32,256], index: 1, kind: input, shape index: {}]   ;;  %s1340_s2 = inlined_call_operand.vmem [shape: f32[1,256], index: 2, kind: input, shape index: {}]   ;;  %s1341_s3 = inlined_call_operand.hbm [shape: bf16[256,128], index: 3, kind: input, shape index: {}]   ;;  %s1342_s4 = inlined_call_operand.vmem [shape: f32[1,128], index: 4, kind: input, shape index: {}]   ;;  %s1343_s5 = inlined_call_operand.hbm [shape: bf16[128,128], index: 5, kind: input, shape index: {}]   ;;  %s1344_s6 = inlined_call_operand.vmem [shape: f32[1,128], index: 6, kind: input, shape index: {}]   ;;  %s1345_s7 = inlined_call_operand.hbm [shape: bf16[128,128], index: 7, kind: input, shape index: {}]   ;;  %s1346_s8 = inlined_call_operand.vmem [shape: f32[1,128], index: 8, kind: input, shape index: {}]   ;;  %s1347_s9 = inlined_call_operand.hbm [shape: bf16[128,128], index: 9, kind: input, shape index: {}]   ;;  %s1348_s10 = inlined_call_operand.vmem [shape: f32[1,128], index: 10, kind: input, shape index: {}]   ;;  %s1349_s11 = inlined_call_operand.vmem [shape: f32[1,128], index: 11, kind: input, shape index: {}]   ;;  %s1350_s12 = inlined_call_operand.<no memory space> [shape: f32[1,1], index: 12, kind: input, shape index: {}]   ;;  %s1351_s13 = inlined_call_operand.vmem [shape: f32[8,1], index: 13, kind: output, shape index: {}]  }
   0x1   :  { %v18_v0 = vstv %s1350_s12 }
   0x2   :  { %19 = vst [vmem:[#allocation2] sm:$0x1] %v18_v0 }
   0x3   :  { %20 = vsyncpa [#allocation4], 0 }
   0x4   :  { %21 = vsyncpa [#allocation6], 0 }
   0x5   :  { %22 = vsyncpa [#allocation9], 0 }
   0x6   :  { %23 = vsyncpa [#allocation12], 0  ;;  %s1117_s27 = smov [#allocation5]   ;;  %s977_s14 = scalar_lea.hbm %s1339_s1, 512 }
   0x7   :  { %s39_s28 = sshll.u32 %s1117_s27, 4  ;;  %p978_p0 = scmp.ne.s32.totalorder %s1339_s1, %s977_s14  ;;  %s40_s28 = int_to_ptr.vmem [resolvable:$true] %s39_s28 }
   0x8   :  { %p981_p1 = scmp.lt.u32.totalorder %s977_s14, %s1339_s1 }
   0xa   :  { %p983_p2 = pnand %p981_p1, %p978_p0 }
   0xc   :  { %986 = shalt.err (!%p983_p2)
}
   0xd   :  { %s987_s12 = scalar_lea.vmem %s40_s28, 512  ;;  %p992_p4 = scmp.lt.s32.totalorder %s40_s28, %s40_s28 }
   0xe   :  { %p988_p3 = scmp.ne.s32.totalorder %s40_s28, %s987_s12  ;;  %p993_p5 = scmp.lt.s32.totalorder %s987_s12, %s987_s12 }
  0x10   :  { %p994_p6 = por %p993_p5, %p992_p4 }
  0x12   :  { %p995_p7 = pnand %p994_p6, %p988_p3 }
  0x14   :  { %998 = shalt.err (!%p995_p7)
}
  0x15   :  { %s1118_s19 = smov 128   ;;  %s1119_s20 = smov 8  }
  0x16   :  { %45 = dma.hbm_to_vmem [thread:$0]  %s1339_s1, 512, %s40_s28, [#allocation6], %s1118_s19, %s1118_s19, %s1119_s20  }
  0x17   :  { %s1120_s23 = smov [#allocation8]   ;;  %s1121_s25 = smov [#allocation3]  }
  0x18   :  { %s67_s24 = sshll.u32 %s1120_s23, 4  ;;  %s30_s26 = sshll.u32 %s1121_s25, 4  ;;  %s68_s24 = int_to_ptr.vmem [resolvable:$true] %s67_s24  ;;  %s31_s26 = int_to_ptr.vmem [resolvable:$true] %s30_s26 }
  0x19   :  { %s999_s30 = scalar_lea.hbm %s1343_s5, 1024 }
  0x1a   :  { %p1000_p8 = scmp.ne.s32.totalorder %s1343_s5, %s999_s30  ;;  %p1003_p9 = scmp.lt.u32.totalorder %s999_s30, %s1343_s5 }
  0x1c   :  { %p1005_p10 = pnand %p1003_p9, %p1000_p8 }
  0x1e   :  { %1008 = shalt.err (!%p1005_p10)
}
  0x1f   :  { %s1009_s1 = scalar_lea.vmem %s68_s24, 1024  ;;  %p1014_p12 = scmp.lt.s32.totalorder %s68_s24, %s68_s24 }
  0x20   :  { %p1010_p11 = scmp.ne.s32.totalorder %s68_s24, %s1009_s1  ;;  %p1015_p13 = scmp.lt.s32.totalorder %s1009_s1, %s1009_s1 }
  0x22   :  { %p1016_p0 = por %p1015_p13, %p1014_p12 }
  0x24   :  { %p1017_p1 = pnand %p1016_p0, %p1010_p11 }
  0x26   :  { %1020 = shalt.err (!%p1017_p1)
}
  0x27   :  { %s1122_s28 = smov 64   ;;  %s1123_s18 = smov 4  }
  0x28   :  { %73 = dma.hbm_to_vmem [thread:$0]  %s1343_s5, 1024, %s68_s24, [#allocation9], %s1122_s28, %s1122_s28, %s1123_s18  }
  0x29   :  { %s1021_s22 = scalar_lea.hbm %s1338_s0, 128 }
  0x2a   :  { %p1022_p2 = scmp.ne.s32.totalorder %s1338_s0, %s1021_s22  ;;  %p1025_p3 = scmp.lt.u32.totalorder %s1021_s22, %s1338_s0 }
  0x2c   :  { %p1027_p4 = pnand %p1025_p3, %p1022_p2 }
  0x2e   :  { %1030 = shalt.err (!%p1027_p4)
}
  0x2f   :  { %s1031_s30 = scalar_lea.vmem %s31_s26, 128  ;;  %p1036_p6 = scmp.lt.s32.totalorder %s31_s26, %s31_s26 }
  0x30   :  { %p1032_p5 = scmp.ne.s32.totalorder %s31_s26, %s1031_s30  ;;  %p1037_p7 = scmp.lt.s32.totalorder %s1031_s30, %s1031_s30 }
  0x32   :  { %p1038_p8 = por %p1037_p7, %p1036_p6 }
  0x34   :  { %p1039_p9 = pnand %p1038_p8, %p1032_p5 }
  0x36   :  { %1042 = shalt.err (!%p1039_p9)
}
  0x37   :  { %33 = dma.hbm_to_vmem [thread:$0]  %s1338_s0, 128, %s31_s26, [#allocation4]  }
  0x38   :  { %s1124_s14 = smov [#allocation7]   ;;  %s1125_s16 = smov [#allocation10]  }
  0x39   :  { %s53_s15 = sshll.u32 %s1124_s14, 4  ;;  %s81_s17 = sshll.u32 %s1125_s16, 4  ;;  %s54_s15 = int_to_ptr.vmem [resolvable:$true] %s53_s15  ;;  %s82_s17 = int_to_ptr.vmem [resolvable:$true] %s81_s17 }
  0x3a   :  { %s1043_s19 = scalar_lea.hbm %s1341_s3, 2048 }
  0x3b   :  { %p1044_p10 = scmp.ne.s32.totalorder %s1341_s3, %s1043_s19  ;;  %p1047_p11 = scmp.lt.u32.totalorder %s1043_s19, %s1341_s3 }
  0x3d   :  { %p1049_p12 = pnand %p1047_p11, %p1044_p10 }
  0x3f   :  { %1052 = shalt.err (!%p1049_p12)
}
  0x40   :  { %s1053_s0 = scalar_lea.vmem %s54_s15, 2048  ;;  %p1058_p0 = scmp.lt.s32.totalorder %s54_s15, %s54_s15 }
  0x41   :  { %p1054_p13 = scmp.ne.s32.totalorder %s54_s15, %s1053_s0  ;;  %p1059_p1 = scmp.lt.s32.totalorder %s1053_s0, %s1053_s0 }
  0x43   :  { %p1060_p2 = por %p1059_p1, %p1058_p0 }
  0x45   :  { %p1061_p3 = pnand %p1060_p2, %p1054_p13 }
  0x47   :  { %1064 = shalt.err (!%p1061_p3)
}
  0x48   :  { %59 = dma.hbm_to_vmem [thread:$0]  %s1341_s3, 2048, %s54_s15, [#allocation6], %s1122_s28, %s1122_s28, %s1123_s18  }
  0x49   :  { %s1065_s30 = scalar_lea.hbm %s1345_s7, 1024 }
  0x4a   :  { %p1066_p4 = scmp.ne.s32.totalorder %s1345_s7, %s1065_s30  ;;  %p1069_p5 = scmp.lt.u32.totalorder %s1065_s30, %s1345_s7 }
  0x4c   :  { %p1071_p6 = pnand %p1069_p5, %p1066_p4 }
  0x4e   :  { %1074 = shalt.err (!%p1071_p6)
}
  0x4f   :  { %s1075_s1 = scalar_lea.vmem %s82_s17, 1024  ;;  %p1080_p8 = scmp.lt.s32.totalorder %s82_s17, %s82_s17 }
  0x50   :  { %p1076_p7 = scmp.ne.s32.totalorder %s82_s17, %s1075_s1  ;;  %p1081_p9 = scmp.lt.s32.totalorder %s1075_s1, %s1075_s1 }
  0x52   :  { %p1082_p10 = por %p1081_p9, %p1080_p8 }
  0x54   :  { %p1083_p11 = pnand %p1082_p10, %p1076_p7 }
  0x56   :  { %1086 = shalt.err (!%p1083_p11)
}
  0x57   :  { %87 = dma.hbm_to_vmem [thread:$0]  %s1345_s7, 1024, %s82_s17, [#allocation9], %s1122_s28, %s1122_s28, %s1123_s18  }
  0x58   :  { %s1126_s12 = smov [#allocation11]   ;;  %s1087_s22 = scalar_lea.hbm %s1347_s9, 1024 }
  0x59   :  { %s95_s19 = sshll.u32 %s1126_s12, 4  ;;  %p1088_p12 = scmp.ne.s32.totalorder %s1347_s9, %s1087_s22  ;;  %s96_s19 = int_to_ptr.vmem [resolvable:$true] %s95_s19 }
  0x5a   :  { %p1091_p13 = scmp.lt.u32.totalorder %s1087_s22, %s1347_s9 }
  0x5c   :  { %p1093_p0 = pnand %p1091_p13, %p1088_p12 }
  0x5e   :  { %1096 = shalt.err (!%p1093_p0)
}
  0x5f   :  { %s1097_s27 = scalar_lea.vmem %s96_s19, 1024  ;;  %p1102_p2 = scmp.lt.s32.totalorder %s96_s19, %s96_s19 }
  0x60   :  { %p1098_p1 = scmp.ne.s32.totalorder %s96_s19, %s1097_s27  ;;  %p1103_p3 = scmp.lt.s32.totalorder %s1097_s27, %s1097_s27 }
  0x62   :  { %p1104_p4 = por %p1103_p3, %p1102_p2 }
  0x64   :  { %p1105_p5 = pnand %p1104_p4, %p1098_p1 }
  0x66   :  { %1108 = shalt.err (!%p1105_p5)
}
  0x67   :  { %101 = dma.hbm_to_vmem [thread:$0]  %s1347_s9, 1024, %s96_s19, [#allocation12], %s1122_s28, %s1122_s28, %s1123_s18  }
  0x68   :  { %1109 = dma.done.wait [#allocation4], 128  }
  0x69   :  { %1110 = vsyncadd [#allocation4], 4294967168 }
  0x6a   :  { %1111 = dma.done.wait [#allocation6], 2560  }
  0x6b   :  { %1112 = vsyncadd [#allocation6], 4294964736 }
  0x6c   :  { %1113 = dma.done.wait [#allocation9], 2048  }
  0x6d   :  { %1114 = vsyncadd [#allocation9], 4294965248 }
  0x6e   :  { %1115 = dma.done.wait [#allocation12], 1024  }
  0x6f   :  { %1116 = vsyncadd [#allocation12], 4294966272  ;;  %v1127_v1 = vmov 0   ;;  %v931_v2 = vld [vmem:[#allocation5 + $0x4] ss:$8 sps:$4 sm:$0xff]   ;;  %v127_v6 = vld [vmem:[#allocation3] sm:$0xff]  ;;  %v136_v32 = vlaneseq }
  0x70   :  { %202 = vmatprep.mubr.bf16.mxu0 %v1127_v1  ;;  %v933_v3 = vld [vmem:[#allocation5] ss:$8 sps:$4 sm:$0xff]   ;;  %170 = vmatprep.subr.bf16.mxu0 %v931_v2  ;;  %v934_v4 = vld [vmem:[#allocation5 + $0x14] ss:$8 sps:$4 sm:$0xff]   ;;  %v936_v5 = vld [vmem:[#allocation5 + $0x10] ss:$8 sps:$4 sm:$0xff]   ;;  %v128_v7 = vmul.f32 %v127_v6, %v127_v6 }
  0x71   :  { %171 = vmatpush1.bf16.msra.mxu0 %v933_v3  ;;  %v937_v8 = vld [vmem:[#allocation7 + $0x40] sm:$0xff]   ;;  %v939_v10 = vld [vmem:[#allocation7 + $0x48] sm:$0xff]   ;;  %vm166_vm0 = vcmask 261120   ;;  %v941_v13 = vld [vmem:[#allocation7 + $0x50] sm:$0xff]   ;;  %v1128_v26 = vmov 0.0   ;;  %v137_v33 = vshrl.u32 %v136_v32, 7 }
  0x72   :  { %172 = vmatprep.subr.bf16.mxu0 %v934_v4  ;;  %v938_v9 = vld [vmem:[#allocation7] sm:$0xff]   ;;  %809 = vmatprep.subr.bf16.mxu1 %v937_v8  ;;  %v129_v11 = vpack.c.bf16 %v128_v7, %v128_v7  ;;  %v940_v12 = vld [vmem:[#allocation7 + $0x8] sm:$0xff]   ;;  %v942_v14 = vld [vmem:[#allocation7 + $0x10] sm:$0xff]   ;;  %vm1129_vm1 = vmmov 0   ;;  %vm748_vm2 = vcmask 7168  }
  0x73   :  { %810 = vmatpush3.bf16.msra.mxu1 %v938_v9  ;;  %v943_v15 = vld [vmem:[#allocation7 + $0x58] sm:$0xff]   ;;  %v945_v17 = vld [vmem:[#allocation7 + $0x60] sm:$0xff]   ;;  %v947_v19 = vld [vmem:[#allocation7 + $0x68] sm:$0xff]   ;;  %v138_v34 = vsub.s32 0, %v137_v33  ;;  %v142_v36 = vsub.s32 1, %v137_v33 }
  0x74   :  { %811 = vmatprep.subr.bf16.mxu1 %v939_v10  ;;  %v944_v16 = vld [vmem:[#allocation7 + $0x18] sm:$0xff]   ;;  %v946_v18 = vld [vmem:[#allocation7 + $0x20] sm:$0xff]   ;;  %v948_v20 = vld [vmem:[#allocation7 + $0x28] sm:$0xff]  }
  0x75   :  { %173 = vmatpush1.bf16.msra.mxu0 %v936_v5  ;;  %v949_v21 = vld [vmem:[#allocation7 + $0x70] sm:$0xff]   ;;  %v951_v23 = vld [vmem:[#allocation7 + $0x78] sm:$0xff]   ;;  %v953_v25 = vld [vmem:[#allocation8] sm:$0xff]  }
  0x76   :  { %v950_v22 = vld [vmem:[#allocation7 + $0x30] sm:$0xff]   ;;  %v952_v24 = vld [vmem:[#allocation7 + $0x38] sm:$0xff]   ;;  %858 = vmatprep.subr.bf16.mxu0 %v1128_v26  ;;  %v954_v27 = vld [vmem:[#allocation8 + $0x8] sm:$0xff]  }
  0x77   :  { %812 = vmatpush3.bf16.msra.mxu1 %v940_v12  ;;  %v955_v28 = vld [vmem:[#allocation8 + $0x10] sm:$0xff]   ;;  %v956_v29 = vld [vmem:[#allocation8 + $0x18] sm:$0xff]   ;;  %v957_v30 = vld [vmem:[#allocation8 + $0x20] sm:$0xff]  }
  0x78   :  { %762 = vmatmul.mubr.msk.bf16.vlgmr.msra.gmra.mrb[0].mxu0 %vm166_vm0, %v129_v11  ;;  %813 = vmatprep.subr.bf16.mxu1 %v941_v13  ;;  %v958_v31 = vld [vmem:[#allocation8 + $0x28] sm:$0xff]   ;;  %v134_v35 = vld [vmem:[%s1340_s2] sm:$0x3]  ;;  %v961_v51 = vld [vmem:[#allocation10] sm:$0xff]  }
  0x79   :  { %859 = vmatpush3.bf16.msra.mxu0 %v953_v25  ;;  %v139_v37 = vrot.slane %v134_v35, %v138_v34  ;;  %v143_v38 = vrot.slane %v134_v35, %v142_v36  ;;  %v959_v49 = vld [vmem:[#allocation8 + $0x30] sm:$0xff]   ;;  %v960_v50 = vld [vmem:[#allocation8 + $0x38] sm:$0xff]   ;;  %874 = vmatprep.mubr.msk.bf16.mxu0 %vm1129_vm1, %v1128_v26  ;;  %v962_v52 = vld [vmem:[#allocation10 + $0x8] sm:$0xff]  }
  0x7a   :  { %860 = vmatprep.subr.bf16.mxu0 %v1128_v26  ;;  %v963_v53 = vld [vmem:[#allocation10 + $0x10] sm:$0xff]   ;;  %v964_v54 = vld [vmem:[#allocation10 + $0x18] sm:$0xff]   ;;  %v965_v55 = vld [vmem:[#allocation10 + $0x20] sm:$0xff]  }
  0x7b   :  { %814 = vmatpush3.bf16.msra.mxu1 %v942_v14  ;;  %v966_v56 = vld [vmem:[#allocation10 + $0x28] sm:$0xff]   ;;  %v763_v58 = vld [vmem:[%s1342_s4] ss:$0 sm:$0xff]  ;;  %v968_v3 = vld [vmem:[#allocation10 + $0x38] sm:$0xff]  }
  0x7c   :  { %815 = vmatprep.subr.bf16.mxu1 %v943_v15  ;;  %v967_v2 = vld [vmem:[#allocation10 + $0x30] sm:$0xff]   ;;  %v969_v4 = vld [vmem:[#allocation11] sm:$0xff]   ;;  %v970_v5 = vld [vmem:[#allocation11 + $0x8] sm:$0xff]  }
  0x7d   :  { %861 = vmatpush3.bf16.msra.mxu0 %v954_v27  ;;  %v971_v6 = vld [vmem:[#allocation11 + $0x10] sm:$0xff]   ;;  %v972_v7 = vld [vmem:[#allocation11 + $0x18] sm:$0xff]   ;;  %v973_v8 = vld [vmem:[#allocation11 + $0x20] sm:$0xff]  }
  0x7e   :  { %862 = vmatprep.subr.bf16.mxu0 %v1128_v26  ;;  %v974_v9 = vld [vmem:[#allocation11 + $0x28] sm:$0xff]   ;;  %v780_v10 = vld [vmem:[%s1344_s6] ss:$0 sm:$0xff] }
  0x7f   :  { %816 = vmatpush3.bf16.msra.mxu1 %v944_v16  ;;  %v807_v33 = vld [vmem:[%s1349_s11] ss:$0 sm:$0xff] }
  0x80   :  { %817 = vmatprep.subr.bf16.mxu1 %v945_v17 }
  0x81   :  { %863 = vmatpush3.bf16.msra.mxu0 %v955_v28 }
  0x82   :  { %864 = vmatprep.subr.bf16.mxu0 %v1128_v26 }
  0x83   :  { %818 = vmatpush3.bf16.msra.mxu1 %v946_v18  ;;  %v975_v18 = vld [vmem:[#allocation11 + $0x30] sm:$0xff]  }
  0x84   :  { %819 = vmatprep.subr.bf16.mxu1 %v947_v19  ;;  %v976_v19 = vld [vmem:[#allocation11 + $0x38] sm:$0xff]  }
  0x85   :  { %865 = vmatpush3.bf16.msra.mxu0 %v956_v29  ;;  %v798_v29 = vld [vmem:[%s1348_s10] ss:$0 sm:$0xff] }
  0x86   :  { %866 = vmatprep.subr.bf16.mxu0 %v1128_v26 }
  0x87   :  { %820 = vmatpush3.bf16.msra.mxu1 %v948_v20  ;;  %v789_v20 = vld [vmem:[%s1346_s8] ss:$0 sm:$0xff] }
  0x88   :  { %821 = vmatprep.subr.bf16.mxu1 %v949_v21 }
  0x89   :  { %867 = vmatpush3.bf16.msra.mxu0 %v957_v30 }
  0x8a   :  { %868 = vmatprep.subr.bf16.mxu0 %v1128_v26 }
  0x8b   :  { %822 = vmatpush3.bf16.msra.mxu1 %v950_v22 }
  0x8c   :  { %823 = vmatprep.subr.bf16.mxu1 %v951_v23 }
  0x8d   :  { %869 = vmatpush3.bf16.msra.mxu0 %v958_v31 }
  0x8e   :  { %870 = vmatprep.subr.bf16.mxu0 %v1128_v26 }
  0x8f   :  { %824 = vmatpush3.bf16.msra.mxu1 %v952_v24 }
  0x90   :  { %878 = vmatprep.subr.bf16.mxu1 %v1128_v26 }
  0x91   :  { %871 = vmatpush3.bf16.msra.mxu0 %v959_v49 }
  0x92   :  { %872 = vmatprep.subr.bf16.mxu0 %v1128_v26 }
  0x95   :  { %873 = vmatpush3.bf16.msra.mxu0 %v960_v50 }
  0x96   :  { %898 = vmatprep.subr.bf16.mxu0 %v1128_v26 }
 0x14b   :  { %v204_v39 = vpop.f32.mrb[0].mxu0 }
 0x14c   :  { %v205_v40 = vadd.f32 %v204_v39, %v139_v37  ;;  %v206_v41 = vpop.f32.mrb[1].mxu0  ;;  %v808_v37 = vld [vmem:[#allocation2] ss:$0 sm:$0xff] }
 0x14d   :  { %v207_v42 = vadd.f32 %v206_v41, %v143_v38  ;;  %v208_v43 = vpop.f32.mrb[2].mxu0 }
 0x14e   :  { %v211_v44 = vmax.f32 %v205_v40, 0.0  ;;  %v209_v45 = vpop.f32.mrb[3].mxu0 }
 0x14f   :  { %v212_v46 = vmax.f32 %v207_v42, 0.0 }
 0x150   :  { %v213_v48 = vpack.c.bf16 %v211_v44, %v211_v44 }
 0x151   :  { %v214_v47 = vpack.c.bf16 %v212_v46, %v212_v46 }
 0x153   :  { %382 = vmatprep.mubr.bf16.mxu1 %v214_v47 }
 0x154   :  { %383 = vmatmul.mubr.bf16.vlgmr.msra.gmra.mrb[0].mxu1 %v213_v48 }
 0x155   :  { %894 = vmatprep.mubr.msk.bf16.mxu1 %vm1129_vm1, %v1128_v26  ;;  %879 = vmatpush3.bf16.msra.mxu1 %v961_v51 }
 0x156   :  { %880 = vmatprep.subr.bf16.mxu1 %v1128_v26 }
 0x159   :  { %881 = vmatpush3.bf16.msra.mxu1 %v962_v52 }
 0x15a   :  { %882 = vmatprep.subr.bf16.mxu1 %v1128_v26 }
 0x15d   :  { %883 = vmatpush3.bf16.msra.mxu1 %v963_v53 }
 0x15e   :  { %884 = vmatprep.subr.bf16.mxu1 %v1128_v26 }
 0x161   :  { %885 = vmatpush3.bf16.msra.mxu1 %v964_v54 }
 0x162   :  { %886 = vmatprep.subr.bf16.mxu1 %v1128_v26 }
 0x165   :  { %887 = vmatpush3.bf16.msra.mxu1 %v965_v55 }
 0x166   :  { %888 = vmatprep.subr.bf16.mxu1 %v1128_v26 }
 0x169   :  { %889 = vmatpush3.bf16.msra.mxu1 %v966_v56 }
 0x16a   :  { %890 = vmatprep.subr.bf16.mxu1 %v1128_v26 }
 0x16d   :  { %891 = vmatpush3.bf16.msra.mxu1 %v967_v2 }
 0x16e   :  { %892 = vmatprep.subr.bf16.mxu1 %v1128_v26 }
 0x171   :  { %893 = vmatpush3.bf16.msra.mxu1 %v968_v3 }
 0x227   :  { %v825_v57 = vpop.f32.mrb[0].mxu1 }
 0x228   :  { %v826_v59 = vpop.f32.mrb[1].mxu1 }
 0x229   :  { %v827_v60 = vadd.f32 %v826_v59, %v825_v57  ;;  %v828_v61 = vpop.f32.mrb[2].mxu1 }
 0x22a   :  { %v829_v62 = vpop.f32.mrb[3].mxu1 }
 0x22b   :  { %v385_v63 = vadd.f32 %v827_v60, %v763_v58 }
 0x22d   :  { %v390_v0 = vmax.f32 %v385_v63, 0.0 }
 0x22f   :  { %v391_v1 = vpack.c.bf16 %v390_v0, %v390_v0 }
 0x231   :  { %875 = vmatmul.mubr.bf16.vlgmr.msra.gmra.mrb[4].mxu0 %v391_v1 }
 0x232   :  { %914 = vmatprep.mubr.msk.bf16.mxu0 %vm1129_vm1, %v1128_v26  ;;  %899 = vmatpush3.bf16.msra.mxu0 %v969_v4 }
 0x233   :  { %900 = vmatprep.subr.bf16.mxu0 %v1128_v26 }
 0x236   :  { %901 = vmatpush3.bf16.msra.mxu0 %v970_v5 }
 0x237   :  { %902 = vmatprep.subr.bf16.mxu0 %v1128_v26 }
 0x23a   :  { %903 = vmatpush3.bf16.msra.mxu0 %v971_v6 }
 0x23b   :  { %904 = vmatprep.subr.bf16.mxu0 %v1128_v26 }
 0x23e   :  { %905 = vmatpush3.bf16.msra.mxu0 %v972_v7 }
 0x23f   :  { %906 = vmatprep.subr.bf16.mxu0 %v1128_v26 }
 0x242   :  { %907 = vmatpush3.bf16.msra.mxu0 %v973_v8 }
 0x243   :  { %908 = vmatprep.subr.bf16.mxu0 %v1128_v26 }
 0x246   :  { %909 = vmatpush3.bf16.msra.mxu0 %v974_v9 }
 0x247   :  { %910 = vmatprep.subr.bf16.mxu0 %v1128_v26 }
 0x24a   :  { %911 = vmatpush3.bf16.msra.mxu0 %v975_v18 }
 0x24b   :  { %912 = vmatprep.subr.bf16.mxu0 %v1128_v26 }
 0x24e   :  { %913 = vmatpush3.bf16.msra.mxu0 %v976_v19 }
 0x304   :  { %v497_v11 = vpop.f32.mrb[4].mxu0 }
 0x305   :  { %v498_v12 = vadd.f32 %v780_v10, %v497_v11  ;;  %v876_v13 = vpop.f32.mrb[5].mxu0 }
 0x306   :  { %v500_v14 = vpop.f32.mrb[6].mxu0 }
 0x307   :  { %v503_v15 = vmax.f32 %v498_v12, 0.0  ;;  %v877_v16 = vpop.f32.mrb[7].mxu0 }
 0x309   :  { %v504_v17 = vpack.c.bf16 %v503_v15, %v503_v15 }
 0x30b   :  { %895 = vmatmul.mubr.bf16.vlgmr.msra.gmra.mrb[4].mxu1 %v504_v17 }
 0x3de   :  { %v610_v21 = vpop.f32.mrb[4].mxu1 }
 0x3df   :  { %v611_v22 = vadd.f32 %v789_v20, %v610_v21  ;;  %v896_v23 = vpop.f32.mrb[5].mxu1 }
 0x3e0   :  { %v613_v24 = vpop.f32.mrb[6].mxu1 }
 0x3e1   :  { %v616_v25 = vmax.f32 %v611_v22, 0.0  ;;  %v897_v27 = vpop.f32.mrb[7].mxu1 }
 0x3e3   :  { %v617_v28 = vpack.c.bf16 %v616_v25, %v616_v25 }
 0x3e5   :  { %915 = vmatmul.mubr.bf16.vlgmr.msra.gmra.mrb[8].mxu0 %v617_v28 }
 0x4b8   :  { %v723_v30 = vpop.f32.mrb[8].mxu0 }
 0x4b9   :  { %v724_v26 = vadd.f32 %v798_v29, %v723_v30  ;;  %v916_v31 = vpop.f32.mrb[9].mxu0 }
 0x4ba   :  { %v726_v32 = vpop.f32.mrb[10].mxu0 }
 0x4bb   :  { %v729_v34 = vmax.f32 %v724_v26, 0.0  ;;  %v917_v35 = vpop.f32.mrb[11].mxu0 }
 0x4bd   :  { %v737_v36 = vmul.f32 %v807_v33, %v729_v34 }
 0x4bf   :  { %738 = vadd.xlane.f32.xlu0 %v737_v36 }
 0x54c   :  { %v739_v38 = vpop.xlane.xlu0 %738 }
 0x54d   :  { %v747_v39 = vadd.f32 %v808_v37, %v739_v38 }
 0x54f   :  { %749 = vst.msk [vmem:[%s1351_s13] sm:$0xff] %vm748_vm2, %v747_v39 }
 0x550   :  { %754 = vsyncpa [#allocation4], 1 }
 0x551   :  { %755 = vsyncpa [#allocation6], 1 }
 0x552   :  { %756 = vsyncpa [#allocation9], 1 }
 0x553   :  { %757 = vsyncpa [#allocation12], 1 }

</bundles_post_ra>
